<compile_context>
chip_gen: v7x
topology: tpu7x:2x2x1
jax: 0.10.0
libtpu: 0.0.40
codegen_flags: <defaults>
</compile_context>

<pallas_src>
import functools

import jax
import jax.numpy as jnp
from jax.experimental import pallas as pl
from jax.experimental.pallas import tpu as pltpu


def _round_up(x: int, m: int) -> int:
    return (x + m - 1) // m * m


def _resident_spec(block_shape, index_map):
    """BlockSpec for a constant-index (resident) operand.

    Uses a single pipeline buffer (no point double-buffering a block whose
    index never changes; reclaims VMEM on v7x's 64 MiB).  Falls back to the
    default spec if this jax version's BlockSpec has no pipeline_mode kwarg.
    """
    try:
        return pl.BlockSpec(block_shape, index_map, pipeline_mode=pl.Buffered(1))
    except TypeError:
        return pl.BlockSpec(block_shape, index_map)


# -----------------------------------------------------------------------------
# Kernel 1: fused QKV projection over flattened (B*N, D) rows.
#   qkv = x @ [wq/sqrt(hd) | wk | wv]     (scale pre-folded into the weight)
# -----------------------------------------------------------------------------
def qkv_proj_kernel(x_ref, w_ref, out_ref):
    # x_ref: (TM, D) f32 block; w_ref: (D, 3D) bf16 resident weight.
    x = x_ref[...].astype(jnp.bfloat16)
    out_ref[...] = jnp.dot(
        x, w_ref[...], preferred_element_type=jnp.float32
    ).astype(out_ref.dtype)


# -----------------------------------------------------------------------------
# Kernel 2: per-batch attention core + fused output projection.  grid = (B,)
# -----------------------------------------------------------------------------
def attn_out_kernel(qkv_ref, wo_ref, bo_ref, out_ref, *,
                    emb_dim: int, num_heads: int, head_dim: int):
    D, H, hd = emb_dim, num_heads, head_dim
    qkv = qkv_ref[...]                                   # (N, 3D) bf16, one DMA per b

    # Static Python loop over heads -> static lane slices; H is a small
    # compile-time constant (3-16 for ViT variants).
    ctx_parts = []
    for h in range(H):
        lo = h * hd
        qh = qkv[:, lo:lo + hd]                          # (N, hd) (1/sqrt(hd) folded in)
        kh = qkv[:, D + lo:D + lo + hd]                  # (N, hd)
        vh = qkv[:, 2 * D + lo:2 * D + lo + hd]          # (N, hd)

        # q @ k^T without materializing a transpose: contract last dims.
        scores = jax.lax.dot_general(
            qh, kh, (((1,), (1,)), ((), ())),
            preferred_element_type=jnp.float32)          # (N, N) f32

        # Softmax with f32 statistics; approx reciprocal uses the EUP slot.
        m = jnp.max(scores, axis=-1, keepdims=True)
        e = jnp.exp(scores - m)
        p = e * pl.reciprocal(jnp.sum(e, axis=-1, keepdims=True), approx=True)

        ctx_parts.append(
            jnp.dot(p.astype(jnp.bfloat16), vh,
                    preferred_element_type=jnp.float32))  # (N, hd) f32

    # Concat heads along lanes -> (N, D); ONE full-depth (K=D) W_o matmul + bias.
    ctx = jnp.concatenate(ctx_parts, axis=-1).astype(jnp.bfloat16)
    out = jnp.dot(ctx, wo_ref[...], preferred_element_type=jnp.float32)
    out = out + bo_ref[...]
    out_ref[0] = out.astype(out_ref.dtype)


# -----------------------------------------------------------------------------
# One-time parameter fusion (call OUTSIDE the per-step hot path).
# -----------------------------------------------------------------------------
def fuse_params(params, *, num_heads: int):
    D = params["wq"].shape[0]
    hd = D // num_heads
    inv_sqrt_dh = 1.0 / (hd ** 0.5)
    w_qkv = jnp.concatenate(
        [params["wq"] * inv_sqrt_dh, params["wk"], params["wv"]],
        axis=1).astype(jnp.bfloat16)                     # (D, 3D)
    return {
        "w_qkv": w_qkv,
        "w_o": params["wo"].astype(jnp.bfloat16),        # (D, D)
        "b_o": params["bo"].reshape(1, D).astype(jnp.float32),  # (1, D)
    }


# -----------------------------------------------------------------------------
# Wrapper
# -----------------------------------------------------------------------------
def multi_head_self_attention(z, fused, *, num_heads: int):
    """z: (B, N, D) f32.  fused: output of fuse_params."""
    B, N, D = z.shape
    assert D % num_heads == 0
    hd = D // num_heads
    w_qkv, w_o, b_o = fused["w_qkv"], fused["w_o"], fused["b_o"]

    R = B * N
    x2d = z.reshape(R, D)                                # metadata-only reshape

    # Row tile for the HBM-bound projection: as large as reasonable (<=512),
    # but capped so the 'parallel' axis has >=2 grid steps (v7x has 2 TCs).
    TM = min(512, _round_up(R, 8))
    if R >= 16:
        TM = min(TM, _round_up(pl.cdiv(R, 2), 8))

    cparams = pltpu.CompilerParams(
        dimension_semantics=("parallel",),
        # Raise the scoped-VMEM limit (v5e default ~16 MiB); 32 MiB fits the
        # scoped budget on v5e/v6e/v7x.
        vmem_limit_bytes=32 * 1024 * 1024)

    # ---- Kernel 1: fused QKV projection ----
    qkv = pl.pallas_call(
        qkv_proj_kernel,
        out_shape=jax.ShapeDtypeStruct((R, 3 * D), jnp.bfloat16),
        grid_spec=pltpu.PrefetchScalarGridSpec(
            num_scalar_prefetch=0,
            grid=(pl.cdiv(R, TM),),
            in_specs=[
                pl.BlockSpec((TM, D), lambda i: (i, 0)),          # activations
                _resident_spec((D, 3 * D), lambda i: (0, 0)),     # fused weight
            ],
            out_specs=pl.BlockSpec((TM, 3 * D), lambda i: (i, 0)),
        ),
        compiler_params=cparams,
    )(x2d, w_qkv)

    # ---- Kernel 2: attention + output projection, one grid step per batch ----
    # qkv is consumed directly as (N, 3D) row-slabs of the (B*N, 3D) array:
    # no transpose / relayout / extra HBM pass between the two kernels.
    kernel = functools.partial(
        attn_out_kernel, emb_dim=D, num_heads=num_heads, head_dim=hd)

    out = pl.pallas_call(
        kernel,
        out_shape=jax.ShapeDtypeStruct((B, N, D), z.dtype),
        grid_spec=pltpu.PrefetchScalarGridSpec(
            num_scalar_prefetch=0,
            grid=(B,),
            in_specs=[
                pl.BlockSpec((N, 3 * D), lambda b: (b, 0)),       # qkv rows of batch b
                _resident_spec((D, D), lambda b: (0, 0)),         # W_o (resident)
                pl.BlockSpec((1, D), lambda b: (0, 0)),           # bias
            ],
            out_specs=pl.BlockSpec((1, N, D), lambda b: (b, 0, 0)),
        ),
        compiler_params=pltpu.CompilerParams(
            dimension_semantics=("parallel",),
            vmem_limit_bytes=32 * 1024 * 1024),
    )(qkv, w_o, b_o)

    return out


# -----------------------------------------------------------------------------
# Pure-JAX f32 reference (same math as the PyTorch module) for a sanity check
# -----------------------------------------------------------------------------
def reference(z, p, *, num_heads: int):
    B, N, D = z.shape
    hd = D // num_heads
    q = (z @ p["wq"]).reshape(B, N, num_heads, hd).transpose(0, 2, 1, 3)
    k = (z @ p["wk"]).reshape(B, N, num_heads, hd).transpose(0, 2, 1, 3)
    v = (z @ p["wv"]).reshape(B, N, num_heads, hd).transpose(0, 2, 1, 3)
    dots = jnp.einsum("bhnd,bhmd->bhnm", q, k) / (hd ** 0.5)
    attn = jax.nn.softmax(dots, axis=-1)
    o = jnp.einsum("bhnm,bhmd->bhnd", attn, v)
    o = o.transpose(0, 2, 1, 3).reshape(B, N, D)
    return o @ p["wo"] + p["bo"]


# -----------------------------------------------------------------------------
# Main
# -----------------------------------------------------------------------------
if __name__ == "__main__":
    # Small shapes consistent with the module (head=3 as in the spec default).
    B, N, D, num_heads = 2, 16, 48, 3                    # head_dim = 16

    key = jax.random.PRNGKey(0)
    ks = jax.random.split(key, 6)
    scale = 0.02

    params = {
        # weights stored as (in, out) = PyTorch weight.T
        "wq": scale * jax.random.normal(ks[0], (D, D), jnp.float32),
        "wk": scale * jax.random.normal(ks[1], (D, D), jnp.float32),
        "wv": scale * jax.random.normal(ks[2], (D, D), jnp.float32),
        "wo": scale * jax.random.normal(ks[3], (D, D), jnp.float32),
        "bo": scale * jax.random.normal(ks[4], (1, D), jnp.float32),
    }
    z = jax.random.normal(ks[5], (B, N, D), jnp.float32)

    # One-time weight fusion/cast (outside the hot path).
    fused = fuse_params(params, num_heads=num_heads)

    out = multi_head_self_attention(z, fused, num_heads=num_heads)
    out = jax.block_until_ready(out)

    ref = reference(z, params, num_heads=num_heads)
    assert out.shape == (B, N, D)
    max_diff = jnp.max(jnp.abs(out - ref))
    # bf16 MXU operands (f32 accumulation) -> loosened tolerance vs f32 reference.
    assert jnp.allclose(out, ref, atol=1e-2, rtol=1e-2), f"max abs diff {max_diff}"

    print("KERNEL_OK")
</pallas_src>

<mosaic_0001>
module attributes {stable_mosaic.version = 11 : i64} {
  func.func @qkv_proj_kernel(%arg0: i32, %arg1: memref<16x48xf32, #tpu.memory_space<vmem>>, %arg2: memref<48x144xbf16, #tpu.memory_space<vmem>>, %arg3: memref<16x144xbf16, #tpu.memory_space<vmem>>) attributes {dimension_semantics = [#tpu.dimension_semantics<parallel>], iteration_bounds = array<i64: 2>, scalar_prefetch = 0 : i64, scratch_operands = 0 : i64, tpu.core_type = #tpu.core_type<tc>, window_params = [{transform_indices = @transform_0, window_bounds = array<i64: 16, 48>}, {pipeline_mode = #tpu.pipeline_mode<synchronous>, transform_indices = @transform_1, window_bounds = array<i64: 48, 144>}, {transform_indices = @transform_2, window_bounds = array<i64: 16, 144>}]} {
    %c0 = arith.constant 0 : index
    %c0_0 = arith.constant 0 : index
    %0 = vector.load %arg1[%c0, %c0_0] : memref<16x48xf32, #tpu.memory_space<vmem>>, vector<16x48xf32>
    %1 = arith.truncf %0 : vector<16x48xf32> to vector<16x48xbf16>
    %c0_1 = arith.constant 0 : index
    %c0_2 = arith.constant 0 : index
    %2 = vector.load %arg2[%c0_1, %c0_2] : memref<48x144xbf16, #tpu.memory_space<vmem>>, vector<48x144xbf16>
    %cst = arith.constant dense<0.000000e+00> : vector<16x144xf32>
    %3 = tpu.matmul %1, %2, %cst {dimension_numbers = #tpu.dot_dimension_numbers<[1], [0], [0], [1], [0, 0, 1, 1], [], []>} : vector<16x48xbf16>, vector<48x144xbf16>, vector<16x144xf32> -> vector<16x144xf32>
    %4 = arith.truncf %3 : vector<16x144xf32> to vector<16x144xbf16>
    %c0_3 = arith.constant 0 : index
    %c0_4 = arith.constant 0 : index
    %5 = vector.load %arg3[%c0_3, %c0_4] : memref<16x144xbf16, #tpu.memory_space<vmem>>, vector<16x144xbf16>
    tpu.vector_store %arg3[%c0_3, %c0_4], %4 {strides = array<i32>} : memref<16x144xbf16, #tpu.memory_space<vmem>>, vector<16x144xbf16>,
    return
  }
  func.func @transform_0(%arg0: i32) -> (i32, i32) {
    %c0_i32 = arith.constant 0 : i32
    %c0_i32_0 = arith.constant 0 : i32
    return %arg0, %c0_i32 : i32, i32
  }
  func.func @transform_1(%arg0: i32) -> (i32, i32) {
    %c0_i32 = arith.constant 0 : i32
    %c0_i32_0 = arith.constant 0 : i32
    %c0_i32_1 = arith.constant 0 : i32
    return %c0_i32, %c0_i32_0 : i32, i32
  }
  func.func @transform_2(%arg0: i32) -> (i32, i32) {
    %c0_i32 = arith.constant 0 : i32
    %c0_i32_0 = arith.constant 0 : i32
    return %arg0, %c0_i32 : i32, i32
  }
}

</mosaic_0001>

<bundles_post_ra>
// kernel: tpu_custom_call.1
= control target key start
LH: loop header
LB: loop body
LE: loop exit
PB: predicated region body
PF: predicated region fallthrough
CT: control target
= control target key end

     0   :  { %7 = vsyncpa [#allocation3], 0  ;;  %s843_s0 = inlined_call_operand.hbm [shape: f32[32,48], index: 0, kind: input, shape index: {}]   ;;  %s844_s1 = inlined_call_operand.hbm [shape: bf16[48,144], index: 1, kind: input, shape index: {}]   ;;  %s845_s2 = inlined_call_operand.hbm [shape: bf16[32,144], index: 2, kind: output, shape index: {}]  }
   0x1   :  { %9 = vsyncpa [#allocation3 + $0x1], 0 }
   0x2   :  { %10 = vsyncpa [#allocation6], 0 }
   0x3   :  { %11 = vsyncpa [#allocation4], 0 }
   0x4   :  { %13 = vsyncpa [#allocation4 + $0x1], 0  ;;  %s636_s9 = smov 0   ;;  %s638_s10 = smov 0  }
   0x5   :  { %s640_s11 = smov 0   ;;  %s642_s12 = smov 0  }
   0x6 LB: > { %s657_s13 = sadd.s32 4294967295, %s611_s12   ;;  %s381_s14 = sadd.s32 4294967294, %s611_s12   ;;  %s611_s12 = sphi %s642_s12, %s865_s12   ;;  %s607_s11 = sphi %s640_s11, %s864_s11   ;;  %s603_s10 = sphi %s638_s10, %s863_s10   ;;  %s599_s9 = sphi %s636_s9, %s862_s9  }
   0x7   : > { %p39_p0 = scmp.ne.s32.totalorder %s603_s10, %s599_s9  ;;  %p846_p1 = scmp.eq.s32.totalorder %s657_s13, 0 }
   0x8   : > { %p90_p3 = scmp.eq.s32.totalorder %s381_s14, 1  ;;  %p382_p5 = scmp.ge.s32.totalorder %s611_s12, 1 }
   0x9   : > { %p666_p4 = por %p846_p1, %p39_p0  ;;  %p97_p7 = scmp.lt.s32.totalorder %s611_s12, 3 }
   0xa   : > { %p671_p6 = por %p90_p3, %p39_p0  ;;  %s613_s18 = smov [#allocation5]  }
   0xb   : > { %s849_s15 = scalar_select %p666_p4, 1, 0 }
   0xc   : > { %s850_s16 = scalar_select %p671_p6, 1, 0 }
   0xd   : > { %p676_p8 = pnand %p382_p5, %p97_p7  ;;  %s109_s19 = sshll.u32 %s613_s18, 4  ;;  %s680_s19 = int_to_ptr.vmem [resolvable:$true] %s109_s19 }
   0xe   : > { %s692_s21 = sadd.s32 1, %s611_s12   ;;  %s26_s22 = sadd.s32 1, %s607_s11 }
   0xf   : > { %s851_s17 = scalar_select %p676_p8, 1, 0 }
  0x10   : > { %p420_p9 = pneg %p676_p8  ;;  %s23_s23 = ssub.s32 %s611_s12, %s692_s21 }
  0x11   : > { %s483_s26 = scalar_lea.hbm %s844_s1, 768 }
  0x12   : > { %p687_p11 = pnand %p420_p9, %p846_p1  ;;  %p484_p12 = scmp.ne.s32.totalorder %s844_s1, %s483_s26 }
  0x13   : > { %p490_p5 = scmp.lt.u32.totalorder %s483_s26, %s844_s1 }
  0x14   : > { %p485_p13 = pneg %p687_p11 }
  0x16   : > { %p486_p0 = pnand %p485_p13, %p484_p12 }
  0x18   : > { %p487_p3 = pneg %p486_p0 }
  0x1a   : > { %p492_p7 = pnand %p490_p5, %p487_p3 }
  0x1c   : > { %495 = shalt.err (!%p492_p7)
}
  0x1d   : > { %s496_s3 = scalar_lea.vmem %s680_s19, 768  ;;  %p504_p2 = scmp.lt.s32.totalorder %s680_s19, %s680_s19 }
  0x1e   : > { %p497_p9 = scmp.ne.s32.totalorder %s680_s19, %s496_s3  ;;  %p505_p6 = scmp.lt.s32.totalorder %s496_s3, %s496_s3 }
  0x20   : > { %p499_p10 = pnand %p497_p9, %p485_p13  ;;  %p506_p4 = por %p505_p6, %p504_p2 }
  0x22   : > { %p500_p1 = pneg %p499_p10 }
  0x24   : > { %p507_p8 = pnand %p506_p4, %p500_p1 }
  0x26   : > { %510 = shalt.err (!%p507_p8)
}
  0x27   : > { %s614_s4 = smov 128   ;;  %s615_s5 = smov 8  }
  0x28   : > { %423 = dma.hbm_to_vmem [thread:$0]  (!%p687_p11), %s844_s1, 768, %s680_s19, [#allocation6], %s614_s4, %s614_s4, %s615_s5  }
  0x29   : > { %p24_p1 = scmp.eq.s32.totalorder %s23_s23, 0  ;;  %p33_p2 = scmp.ne.s32.totalorder %s607_s11, %s603_s10 }
  0x2a   : > { %p34_p4 = scmp.eq.s32.totalorder %s611_s12, 0  ;;  %p433_p6 = scmp.lt.s32.totalorder %s611_s12, 2 }
  0x2b   : > { %s726_s8 = scalar_select %p24_p1, %s607_s11, %s26_s22  }
  0x2c   : > { %p35_p8 = por %p34_p4, %p33_p2  ;;  %p853_p10 = scmp.eq.s32.totalorder %s657_s13, 1 }
  0x2d   : > { %s123_s18 = sand.u32 1, %s607_s11   ;;  %s407_s20 = sshll.u32 %s611_s12, 8 }
  0x2e   : > { %p730_p12 = por %p853_p10, %p33_p2  ;;  %s385_s24 = sshll.u32 %s123_s18, 4 }
  0x2f   : > { %s739_s27 = scalar_lea.hbm %s843_s0, %s407_s20  ;;  %s127_s19 = scalar_lea.vmem [#allocation2], %s385_s24 }
  0x30   : > { %s134_s22 = sshll.u32 %s127_s19, 4  ;;  %p741_p11 = pnand %p433_p6, %p35_p8  ;;  %s745_s22 = int_to_ptr.vmem [resolvable:$true] %s134_s22 }
  0x31   : > { %s747_s28 = scalar_lea.sflag [#allocation3], %s123_s18  ;;  %s511_s29 = scalar_lea.hbm %s739_s27, 256 }
  0x32   : > { %p512_p13 = scmp.ne.s32.totalorder %s739_s27, %s511_s29  ;;  %p513_p0 = pneg %p741_p11 }
  0x33   : > { %s516_s6 = scalar_lea.hbm %s843_s0, 512  ;;  %p517_p7 = scmp.lt.u32.totalorder %s739_s27, %s843_s0 }
  0x34   : > { %p514_p3 = pnand %p513_p0, %p512_p13  ;;  %p518_p9 = scmp.lt.u32.totalorder %s516_s6, %s511_s29 }
  0x35   : > { %p520_p2 = scmp.lt.u32.totalorder %s511_s29, %s739_s27 }
  0x36   : > { %p515_p5 = pneg %p514_p3  ;;  %p519_p1 = por %p518_p9, %p517_p7 }
  0x38   : > { %p521_p4 = por %p520_p2, %p519_p1 }
  0x3a   : > { %p522_p6 = pnand %p521_p4, %p515_p5 }
  0x3c   : > { %525 = shalt.err (!%p522_p6)
}
  0x3d   : > { %s526_s18 = scalar_lea.vmem %s745_s22, 256  ;;  %s616_s24 = smov [#allocation2]  }
  0x3e   : > { %p527_p8 = scmp.ne.s32.totalorder %s745_s22, %s526_s18  ;;  %s531_s25 = sshll.u32 %s616_s24, 4  ;;  %s532_s25 = int_to_ptr.vmem [resolvable:$false] %s531_s25 }
  0x3f   : > { %s533_s26 = scalar_lea.vmem %s532_s25, 512  ;;  %p534_p3 = scmp.lt.s32.totalorder %s745_s22, %s532_s25 }
  0x40   : > { %p529_p10 = pnand %p527_p8, %p513_p0  ;;  %p535_p7 = scmp.lt.s32.totalorder %s533_s26, %s526_s18 }
  0x42   : > { %p530_p13 = pneg %p529_p10  ;;  %p536_p9 = por %p535_p7, %p534_p3 }
  0x44   : > { %p537_p1 = pnand %p536_p9, %p530_p13 }
  0x46   : > { %540 = shalt.err (!%p537_p1)
}
  0x47   : > { %427 = dma.hbm_to_vmem [thread:$0]  (!%p741_p11), %s739_s27, 256, %s745_s22, %s747_s28, %s614_s4, %s614_s4, %s615_s5  }
  0x48   : > { %p856_p0 = scmp.ne.s32.totalorder %s851_s17, 0 }
  0x49   : > { %s781_s19 = sand.u32 (!%p856_p0), 1, %s603_s10   ;;  %p857_p5 = scmp.ne.s32.totalorder (!%p856_p0), %s849_s15, 0 }
  0x4a   : > { %146 = sbr.rel (%p856_p0) target bundleno = 330 (0x14a), region = 28  ;;  %s389_s29 = sshll.u32 (!%p856_p0), %s781_s19, 4 }
  0x4b   : > { %s149_s30 = scalar_lea.sflag (!%p856_p0), [#allocation3], %s781_s19  ;;  %s152_s3 = scalar_lea.vmem (!%p856_p0), [#allocation2], %s389_s29 }
  0x51   : > { %586 = dma.done.wait (%p857_p5), %s149_s30, 256  }
  0x52   : > { %588 = vsyncadd (%p857_p5), %s149_s30, 4294967040  ;;  %p858_p2 = scmp.eq.s32.totalorder %s657_s13, 0 }
  0x54   : > { %590 = dma.done.wait (%p858_p2), [#allocation6], 768   ;;  %p859_p11 = pmov %p858_p2 }
  0x55   : > { %v617_v0 = vmov 0   ;;  %v474_v1 = vld [vmem:[#allocation5 + $0x4] ss:$8 sps:$4 sm:$0xff]   ;;  %v476_v2 = vld [vmem:[#allocation5] ss:$8 sps:$4 sm:$0xff]   ;;  %vm219_vm0 = vcmask 392192  }
  0x56   : > { %592 = vsyncadd (%p859_p11), [#allocation6], 4294966528  ;;  %255 = vmatprep.mubr.bf16.mxu0 %v617_v0  ;;  %223 = vmatprep.subr.bf16.mxu0 %v474_v1  ;;  %v477_v3 = vld [vmem:[#allocation5 + $0x14] ss:$8 sps:$4 sm:$0xff]   ;;  %v479_v4 = vld [vmem:[#allocation5 + $0x10] ss:$8 sps:$4 sm:$0xff]  }
  0x57   : > { %224 = vmatpush1.bf16.msra.mxu0 %v476_v2  ;;  %v480_v5 = vld [vmem:[#allocation5 + $0x24] ss:$8 sps:$4 sm:$0xff]   ;;  %v482_v6 = vld [vmem:[#allocation5 + $0x20] ss:$8 sps:$4 sm:$0xff]   ;;  %vm278_vm1 = vcmask 1043456   ;;  %vm279_vm2 = vcmask 130052  }
  0x58   : > { %225 = vmatprep.subr.bf16.mxu0 %v477_v3  ;;  %v180_v7 = vld [vmem:[%s152_s3] sm:$0xff]  ;;  %v181_v8 = vld [vmem:[%s152_s3 + $0x8] sm:$0xff]  ;;  %s176_s15 = scalar_lea.vmem [#allocation7], %s389_s29  ;;  %s411_s4 = sshll.u32 %s657_s13, 8  ;;  %vm280_vm3 = vmor %vm279_vm2, %vm278_vm1 }
  0x59   : > { %v182_v9 = vpack.c.bf16 %v181_v8, %v180_v7  ;;  %s298_s17 = sshll.u32 %s176_s15, 4  ;;  %s799_s22 = scalar_lea.hbm %s845_s2, %s411_s4  ;;  %s794_s17 = int_to_ptr.vmem [resolvable:$true] %s298_s17 }
  0x5a   : > { %s284_s23 = scalar_lea.sflag [#allocation4], %s781_s19  ;;  %s541_s13 = scalar_lea.vmem %s794_s17, 256 }
  0x5b   : > { %226 = vmatpush1.bf16.msra.mxu0 %v479_v4  ;;  %p542_p4 = scmp.ne.s32.totalorder %s794_s17, %s541_s13  ;;  %s618_s28 = smov [#allocation7]  }
  0x5c   : > { %227 = vmatprep.subr.bf16.mxu0 %v480_v5  ;;  %s545_s6 = sshll.u32 %s618_s28, 4  ;;  %s546_s6 = int_to_ptr.vmem [resolvable:$false] %s545_s6 }
  0x5d   : > { %p543_p6 = pnand %p542_p4, %p730_p12  ;;  %s547_s7 = scalar_lea.vmem %s546_s6, 512 }
  0x5e   : > { %p548_p10 = scmp.lt.s32.totalorder %s794_s17, %s546_s6  ;;  %p549_p13 = scmp.lt.s32.totalorder %s547_s7, %s541_s13 }
  0x5f   : > { %228 = vmatpush1.bf16.msra.mxu0 %v482_v6  ;;  %p544_p8 = pneg %p543_p6 }
  0x60   : > { %p550_p3 = por %p549_p13, %p548_p10 }
  0x62   : > { %398 = vmatmul.mubr.msk.bf16.vlgmr.msra.gmra.mrb[0].mxu0 %vm219_vm0, %v182_v9  ;;  %p551_p7 = pnand %p550_p3, %p544_p8 }
 0x135   : > { %v257_v10 = vpop.f32.mrb[0].mxu0 }
 0x136   : > { %v259_v11 = vpop.f32.mrb[1].mxu0 }
 0x137   : > { %v408_v12 = vpack.c.bf16 %v259_v11, %v257_v10  ;;  %v261_v13 = vpop.f32.mrb[2].mxu0 }
 0x138   : > { %v263_v14 = vpop.f32.mrb[3].mxu0 }
 0x139   : > { %281 = vst.msk [vmem:[%s176_s15] sm:$0xff] %vm280_vm3, %v408_v12  ;;  %v409_v15 = vpack.c.bf16 %v263_v14, %v261_v13 }
 0x13b   : > { %282 = vst.msk [vmem:[%s176_s15 + $0x8] sm:$0xff] %vm280_vm3, %v409_v15 }
 0x13c   : > { %554 = shalt.err (!%p551_p7)
}
 0x13d   : > { %s555_s20 = scalar_lea.hbm %s799_s22, 256  ;;  %s559_s25 = scalar_lea.hbm %s845_s2, 512 }
 0x13e   : > { %p556_p9 = scmp.ne.s32.totalorder %s799_s22, %s555_s20  ;;  %p560_p5 = scmp.lt.u32.totalorder %s799_s22, %s845_s2 }
 0x13f   : > { %p561_p2 = scmp.lt.u32.totalorder %s559_s25, %s555_s20  ;;  %p563_p4 = scmp.lt.u32.totalorder %s555_s20, %s799_s22 }
 0x140   : > { %p557_p1 = pnand %p556_p9, %p730_p12 }
 0x141   : > { %p562_p11 = por %p561_p2, %p560_p5 }
 0x142   : > { %p558_p0 = pneg %p557_p1 }
 0x143   : > { %p564_p6 = por %p563_p4, %p562_p11 }
 0x145   : > { %p565_p8 = pnand %p564_p6, %p558_p0 }
 0x147   : > { %568 = shalt.err (!%p565_p8)
}
 0x148   : > { %s619_s30 = smov 128   ;;  %s620_s3 = smov 8  }
 0x149   : > { %418 = dma.vmem_to_hbm [thread:$0]  (%p730_p12), %s794_s17, 256, %s799_s22, %s284_s23, %s619_s30, %s619_s30, %s620_s3  }
 0x14a PF: > { %s313_s15 = sand.u32 1, %s599_s9   ;;  %p860_p10 = scmp.ne.s32.totalorder %s850_s16, 0 }
 0x14b   : > { %p861_p13 = scmp.ge.s32.totalorder %s611_s12, 2  ;;  %s314_s4 = scalar_lea.sflag [#allocation4], %s313_s15 }
 0x14d   : > { %p429_p3 = pnand %p861_p13, %p860_p10 }
 0x14f   : > { %594 = dma.done.wait (!%p429_p3), %s314_s4, 256  }
 0x150   : > { %596 = vsyncadd (!%p429_p3), %s314_s4, 4294967040  ;;  %p16_p7 = scmp.ge.s32.totalorder %s692_s21, 4   ;;  %s862_s9 = smov %s603_s10 }
 0x151   : > { %s863_s10 = smov %s607_s11  ;;  %s864_s11 = smov %s726_s8 }
 0x152   : > { %s865_s12 = smov %s692_s21  ;;  %18 = sbr.rel (!%p16_p7) target bundleno = 6 (0x6), region = 77 }
 0x159   :  { %319 = vsyncpa [#allocation3], 1 }
 0x15a   :  { %321 = vsyncpa [#allocation3 + $0x1], 1 }
 0x15b   :  { %322 = vsyncpa [#allocation6], 1 }
 0x15c   :  { %323 = vsyncpa [#allocation4], 1 }
 0x15d   :  { %325 = vsyncpa [#allocation4 + $0x1], 1 }

</bundles_post_ra>
